<compile_context>
chip_gen: v6e
topology: v6e:2x2x1
jax: 0.10.0
libtpu: 0.0.40
codegen_flags: <defaults>
</compile_context>

<pallas_src>
import jax
import jax.numpy as jnp
from jax.experimental import pallas as pl
from jax.experimental.pallas import tpu as pltpu


def _round_up(x, m):
    return ((x + m - 1) // m) * m


def _default_ew_dtype():
    """bf16 elementwise only where the VPU is bf16-native (v6e / v7x)."""
    try:
        kind = jax.devices()[0].device_kind.lower()
    except Exception:
        kind = ""
    return jnp.bfloat16 if ("v6" in kind or "v7" in kind) else jnp.float32


def _mlp_kernel(x_ref,
                w1_ref, b1_ref,
                w2_ref, b2_ref,
                w3_ref, b3_ref,
                w4t_ref, b4t_ref,
                o_ref):
    ew = b1_ref.dtype  # elementwise dtype (bf16 on v6e/v7x, f32 on v5e)

    # fc1 + ReLU  (bf16 MXU matmul, f32 accumulate, ew-dtype bias/ReLU)
    h = jnp.dot(x_ref[...].astype(jnp.bfloat16), w1_ref[...],
                preferred_element_type=jnp.float32)
    h = jnp.maximum(h.astype(ew) + b1_ref[...], 0.0).astype(jnp.bfloat16)
    # drop1: identity at inference

    # fc2 + ReLU
    h = jnp.dot(h, w2_ref[...], preferred_element_type=jnp.float32)
    h = jnp.maximum(h.astype(ew) + b2_ref[...], 0.0).astype(jnp.bfloat16)
    # drop2: identity at inference

    # fc3 + ReLU
    h = jnp.dot(h, w3_ref[...], preferred_element_type=jnp.float32)
    h = jnp.maximum(h.astype(ew) + b3_ref[...], 0.0)          # (TM, 64)

    # out layer, computed transposed so the store is lane-dense along batch:
    #   o_t[c, m] = sum_k w4t[c, k] * h[m, k]   ->   (2, TM)
    o_t = jax.lax.dot_general(
        w4t_ref[...], h.astype(jnp.float32),
        dimension_numbers=(((1,), (1,)), ((), ())),
        preferred_element_type=jnp.float32)
    o_ref[...] = (o_t + b4t_ref[...]).astype(o_ref.dtype)


def prepare_params(params, ew_dtype=None):
    """One-time parameter prep: bf16 weight casts, transposed output layer,
    biases in the elementwise dtype.  Do this once, not per forward call."""
    if ew_dtype is None:
        ew_dtype = _default_ew_dtype()
    return {
        "w1": params["w1"].astype(jnp.bfloat16),               # (in, 256)
        "w2": params["w2"].astype(jnp.bfloat16),               # (256, 128)
        "w3": params["w3"].astype(jnp.bfloat16),               # (128, 64)
        "w4t": params["w4"].T.astype(jnp.float32),             # (2, 64)
        "b1": params["b1"].astype(ew_dtype),                   # (1, 256)
        "b2": params["b2"].astype(ew_dtype),                   # (1, 128)
        "b3": params["b3"].astype(ew_dtype),                   # (1, 64)
        "b4t": params["b4"].reshape(-1, 1).astype(jnp.float32),  # (2, 1)
    }


def ann_forward(x, p, *, tile_m=1024):
    """Fused forward pass of ANNModel as a single batch-tiled Pallas kernel.

    x: (B, input_dim) float32
    p: output of prepare_params(...)
    """
    B, input_dim = x.shape
    out_dim = p["w4t"].shape[0]

    # Batch tile: multiple of 128 (lane-dense output blocks), capped so large
    # batches give a grid of >= 2 steps (keeps both v7x TCs busy), no larger
    # than tile_m.  Ragged last block is handled by Pallas masking — no pad.
    tm = max(128, min(tile_m, _round_up(pl.cdiv(B, 2), 128)))
    grid = (pl.cdiv(B, tm),)

    # Constant-index specs keep weights/biases VMEM-resident across grid steps.
    const = lambda a: pl.BlockSpec(a.shape, lambda i: (0, 0))

    flops = 2 * B * (input_dim * 256 + 256 * 128 + 128 * 64 + 64 * out_dim)
    bytes_accessed = (
        x.size * x.dtype.itemsize
        + sum(int(a.size) * a.dtype.itemsize for a in p.values())
        + B * out_dim * 4
    )

    out_t = pl.pallas_call(
        _mlp_kernel,
        out_shape=jax.ShapeDtypeStruct((out_dim, B), jnp.float32),
        grid=grid,
        in_specs=[
            pl.BlockSpec((tm, input_dim), lambda i: (i, 0)),
            const(p["w1"]), const(p["b1"]),
            const(p["w2"]), const(p["b2"]),
            const(p["w3"]), const(p["b3"]),
            const(p["w4t"]), const(p["b4t"]),
        ],
        out_specs=pl.BlockSpec((out_dim, tm), lambda i: (0, i)),
        compiler_params=pltpu.CompilerParams(
            dimension_semantics=("parallel",),
            vmem_limit_bytes=32 * 1024 * 1024,
        ),
        cost_estimate=pl.CostEstimate(
            flops=flops, transcendentals=0, bytes_accessed=bytes_accessed),
    )(x, p["w1"], p["b1"], p["w2"], p["b2"], p["w3"], p["b3"],
      p["w4t"], p["b4t"])

    return out_t.T  # (B, 2); tiny transpose in the wrapper


def init_params(key, input_dim):
    """Deterministic synthetic init (same shapes as the PyTorch module)."""
    dims = [(input_dim, 256), (256, 128), (128, 64), (64, 2)]
    params = {}
    for i, (fan_in, fan_out) in enumerate(dims, start=1):
        key, kw, kb = jax.random.split(key, 3)
        bound = 1.0 / jnp.sqrt(fan_in)
        params[f"w{i}"] = jax.random.uniform(
            kw, (fan_in, fan_out), jnp.float32, -bound, bound)
        params[f"b{i}"] = jax.random.uniform(
            kb, (1, fan_out), jnp.float32, -bound, bound)
    return params


def ann_forward_ref(x, params, ew_dtype=None):
    """Pure-JAX reference using the same bf16-matmul / ew-elementwise recipe."""
    if ew_dtype is None:
        ew_dtype = _default_ew_dtype()
    h = x
    for i in range(1, 4):
        w = params[f"w{i}"].astype(jnp.bfloat16)
        h = jnp.dot(h.astype(jnp.bfloat16), w,
                    preferred_element_type=jnp.float32)
        h = jnp.maximum(h.astype(ew_dtype) + params[f"b{i}"].astype(ew_dtype),
                        0.0)
    o = jnp.dot(h.astype(jnp.float32), params["w4"],
                preferred_element_type=jnp.float32)
    return o + params["b4"]


if __name__ == "__main__":
    key = jax.random.PRNGKey(0)
    key, kx1, kx2 = jax.random.split(key, 3)

    input_dim = 32
    params = init_params(key, input_dim)
    prepared = prepare_params(params)   # one-time cast/transpose (hoisted)

    fwd = jax.jit(ann_forward)

    # Small batch: single ragged block (B < TM), exercises write masking.
    batch = 8
    x = jax.random.normal(kx1, (batch, input_dim), jnp.float32)
    out = jax.block_until_ready(fwd(x, prepared))
    ref = ann_forward_ref(x, params)
    assert out.shape == (batch, 2)
    assert jnp.allclose(out, ref, atol=1e-2, rtol=1e-2), \
        "mismatch vs reference (small batch)"

    # Larger, non-multiple batch: grid of 2 'parallel' steps + ragged last block.
    batch2 = 1000
    x2 = jax.random.normal(kx2, (batch2, input_dim), jnp.float32)
    out2 = jax.block_until_ready(fwd(x2, prepared))
    ref2 = ann_forward_ref(x2, params)
    assert out2.shape == (batch2, 2)
    assert jnp.allclose(out2, ref2, atol=1e-2, rtol=1e-2), \
        "mismatch vs reference (tiled batch)"

    print("KERNEL_OK")
</pallas_src>

<mosaic_0001>
module attributes {stable_mosaic.version = 11 : i64} {
  func.func @_mlp_kernel(%arg0: i32, %arg1: memref<128x32xf32, #tpu.memory_space<vmem>>, %arg2: memref<32x256xbf16, #tpu.memory_space<vmem>>, %arg3: memref<1x256xf32, #tpu.memory_space<vmem>>, %arg4: memref<256x128xbf16, #tpu.memory_space<vmem>>, %arg5: memref<1x128xf32, #tpu.memory_space<vmem>>, %arg6: memref<128x64xbf16, #tpu.memory_space<vmem>>, %arg7: memref<1x64xf32, #tpu.memory_space<vmem>>, %arg8: memref<2x64xf32, #tpu.memory_space<vmem>>, %arg9: memref<2x1xf32, #tpu.memory_space<vmem>>, %arg10: memref<2x128xf32, #tpu.memory_space<vmem>>) attributes {dimension_semantics = [#tpu.dimension_semantics<parallel>], iteration_bounds = array<i64: 1>, scalar_prefetch = 0 : i64, scratch_operands = 0 : i64, tpu.core_type = #tpu.core_type<tc>, window_params = [{transform_indices = @transform_0, window_bounds = array<i64: 128, 32>}, {pipeline_mode = #tpu.pipeline_mode<synchronous>, transform_indices = @transform_1, window_bounds = array<i64: 32, 256>}, {pipeline_mode = #tpu.pipeline_mode<synchronous>, transform_indices = @transform_2, window_bounds = array<i64: 1, 256>}, {pipeline_mode = #tpu.pipeline_mode<synchronous>, transform_indices = @transform_3, window_bounds = array<i64: 256, 128>}, {pipeline_mode = #tpu.pipeline_mode<synchronous>, transform_indices = @transform_4, window_bounds = array<i64: 1, 128>}, {pipeline_mode = #tpu.pipeline_mode<synchronous>, transform_indices = @transform_5, window_bounds = array<i64: 128, 64>}, {pipeline_mode = #tpu.pipeline_mode<synchronous>, transform_indices = @transform_6, window_bounds = array<i64: 1, 64>}, {pipeline_mode = #tpu.pipeline_mode<synchronous>, transform_indices = @transform_7, window_bounds = array<i64: 2, 64>}, {pipeline_mode = #tpu.pipeline_mode<synchronous>, transform_indices = @transform_8, window_bounds = array<i64: 2, 1>}, {transform_indices = @transform_9, window_bounds = array<i64: 2, 128>}]} {
    %c0 = arith.constant 0 : index
    %c0_0 = arith.constant 0 : index
    %0 = vector.load %arg1[%c0, %c0_0] : memref<128x32xf32, #tpu.memory_space<vmem>>, vector<128x32xf32>
    %1 = arith.truncf %0 : vector<128x32xf32> to vector<128x32xbf16>
    %c0_1 = arith.constant 0 : index
    %c0_2 = arith.constant 0 : index
    %2 = vector.load %arg2[%c0_1, %c0_2] : memref<32x256xbf16, #tpu.memory_space<vmem>>, vector<32x256xbf16>
    %cst = arith.constant dense<0.000000e+00> : vector<128x256xf32>
    %3 = tpu.matmul %1, %2, %cst {dimension_numbers = #tpu.dot_dimension_numbers<[1], [0], [0], [1], [0, 0, 1, 1], [], []>} : vector<128x32xbf16>, vector<32x256xbf16>, vector<128x256xf32> -> vector<128x256xf32>
    %c0_3 = arith.constant 0 : index
    %c0_4 = arith.constant 0 : index
    %4 = vector.load %arg3[%c0_3, %c0_4] : memref<1x256xf32, #tpu.memory_space<vmem>>, vector<1x256xf32>
    %5 = vector.broadcast %4 : vector<1x256xf32> to vector<128x256xf32>
    %6 = arith.addf %3, %5 : vector<128x256xf32>
    %cst_5 = arith.constant 0.000000e+00 : f32
    %7 = vector.broadcast %cst_5 : f32 to vector<128x256xf32>
    %8 = arith.maximumf %6, %7 : vector<128x256xf32>
    %9 = arith.truncf %8 : vector<128x256xf32> to vector<128x256xbf16>
    %c0_6 = arith.constant 0 : index
    %c0_7 = arith.constant 0 : index
    %10 = vector.load %arg4[%c0_6, %c0_7] : memref<256x128xbf16, #tpu.memory_space<vmem>>, vector<256x128xbf16>
    %cst_8 = arith.constant dense<0.000000e+00> : vector<128x128xf32>
    %11 = tpu.matmul %9, %10, %cst_8 {dimension_numbers = #tpu.dot_dimension_numbers<[1], [0], [0], [1], [0, 0, 1, 1], [], []>} : vector<128x256xbf16>, vector<256x128xbf16>, vector<128x128xf32> -> vector<128x128xf32>
    %c0_9 = arith.constant 0 : index
    %c0_10 = arith.constant 0 : index
    %12 = vector.load %arg5[%c0_9, %c0_10] : memref<1x128xf32, #tpu.memory_space<vmem>>, vector<1x128xf32>
    %13 = vector.broadcast %12 : vector<1x128xf32> to vector<128x128xf32>
    %14 = arith.addf %11, %13 : vector<128x128xf32>
    %cst_11 = arith.constant 0.000000e+00 : f32
    %15 = vector.broadcast %cst_11 : f32 to vector<128x128xf32>
    %16 = arith.maximumf %14, %15 : vector<128x128xf32>
    %17 = arith.truncf %16 : vector<128x128xf32> to vector<128x128xbf16>
    %c0_12 = arith.constant 0 : index
    %c0_13 = arith.constant 0 : index
    %18 = vector.load %arg6[%c0_12, %c0_13] : memref<128x64xbf16, #tpu.memory_space<vmem>>, vector<128x64xbf16>
    %cst_14 = arith.constant dense<0.000000e+00> : vector<128x64xf32>
    %19 = tpu.matmul %17, %18, %cst_14 {dimension_numbers = #tpu.dot_dimension_numbers<[1], [0], [0], [1], [0, 0, 1, 1], [], []>} : vector<128x128xbf16>, vector<128x64xbf16>, vector<128x64xf32> -> vector<128x64xf32>
    %c0_15 = arith.constant 0 : index
    %c0_16 = arith.constant 0 : index
    %20 = vector.load %arg7[%c0_15, %c0_16] : memref<1x64xf32, #tpu.memory_space<vmem>>, vector<1x64xf32>
    %21 = vector.broadcast %20 : vector<1x64xf32> to vector<128x64xf32>
    %22 = arith.addf %19, %21 : vector<128x64xf32>
    %cst_17 = arith.constant 0.000000e+00 : f32
    %23 = vector.broadcast %cst_17 : f32 to vector<128x64xf32>
    %24 = arith.maximumf %22, %23 : vector<128x64xf32>
    %c0_18 = arith.constant 0 : index
    %c0_19 = arith.constant 0 : index
    %25 = vector.load %arg8[%c0_18, %c0_19] : memref<2x64xf32, #tpu.memory_space<vmem>>, vector<2x64xf32>
    %cst_20 = arith.constant dense<0.000000e+00> : vector<2x128xf32>
    %26 = tpu.matmul %25, %24, %cst_20 {dimension_numbers = #tpu.dot_dimension_numbers<[1], [1], [0], [0], [0, 0, 1, 0], [], []>} : vector<2x64xf32>, vector<128x64xf32>, vector<2x128xf32> -> vector<2x128xf32>
    %c0_21 = arith.constant 0 : index
    %c0_22 = arith.constant 0 : index
    %27 = vector.load %arg9[%c0_21, %c0_22] : memref<2x1xf32, #tpu.memory_space<vmem>>, vector<2x1xf32>
    %28 = vector.broadcast %27 : vector<2x1xf32> to vector<2x128xf32>
    %29 = arith.addf %26, %28 : vector<2x128xf32>
    %c0_23 = arith.constant 0 : index
    %c0_24 = arith.constant 0 : index
    %30 = vector.load %arg10[%c0_23, %c0_24] : memref<2x128xf32, #tpu.memory_space<vmem>>, vector<2x128xf32>
    tpu.vector_store %arg10[%c0_23, %c0_24], %29 {strides = array<i32>} : memref<2x128xf32, #tpu.memory_space<vmem>>, vector<2x128xf32>,
    return
  }
  func.func @transform_0(%arg0: i32) -> (i32, i32) {
    %c0_i32 = arith.constant 0 : i32
    %c0_i32_0 = arith.constant 0 : i32
    return %arg0, %c0_i32 : i32, i32
  }
  func.func @transform_1(%arg0: i32) -> (i32, i32) {
    %c0_i32 = arith.constant 0 : i32
    %c0_i32_0 = arith.constant 0 : i32
    %c0_i32_1 = arith.constant 0 : i32
    return %c0_i32, %c0_i32_0 : i32, i32
  }
  func.func @transform_2(%arg0: i32) -> (i32, i32) {
    %c0_i32 = arith.constant 0 : i32
    %c0_i32_0 = arith.constant 0 : i32
    %c0_i32_1 = arith.constant 0 : i32
    return %c0_i32, %c0_i32_0 : i32, i32
  }
  func.func @transform_3(%arg0: i32) -> (i32, i32) {
    %c0_i32 = arith.constant 0 : i32
    %c0_i32_0 = arith.constant 0 : i32
    %c0_i32_1 = arith.constant 0 : i32
    return %c0_i32, %c0_i32_0 : i32, i32
  }
  func.func @transform_4(%arg0: i32) -> (i32, i32) {
    %c0_i32 = arith.constant 0 : i32
    %c0_i32_0 = arith.constant 0 : i32
    %c0_i32_1 = arith.constant 0 : i32
    return %c0_i32, %c0_i32_0 : i32, i32
  }
  func.func @transform_5(%arg0: i32) -> (i32, i32) {
    %c0_i32 = arith.constant 0 : i32
    %c0_i32_0 = arith.constant 0 : i32
    %c0_i32_1 = arith.constant 0 : i32
    return %c0_i32, %c0_i32_0 : i32, i32
  }
  func.func @transform_6(%arg0: i32) -> (i32, i32) {
    %c0_i32 = arith.constant 0 : i32
    %c0_i32_0 = arith.constant 0 : i32
    %c0_i32_1 = arith.constant 0 : i32
    return %c0_i32, %c0_i32_0 : i32, i32
  }
  func.func @transform_7(%arg0: i32) -> (i32, i32) {
    %c0_i32 = arith.constant 0 : i32
    %c0_i32_0 = arith.constant 0 : i32
    %c0_i32_1 = arith.constant 0 : i32
    return %c0_i32, %c0_i32_0 : i32, i32
  }
  func.func @transform_8(%arg0: i32) -> (i32, i32) {
    %c0_i32 = arith.constant 0 : i32
    %c0_i32_0 = arith.constant 0 : i32
    %c0_i32_1 = arith.constant 0 : i32
    return %c0_i32, %c0_i32_0 : i32, i32
  }
  func.func @transform_9(%arg0: i32) -> (i32, i32) {
    %c0_i32 = arith.constant 0 : i32
    %c0_i32_0 = arith.constant 0 : i32
    return %c0_i32, %arg0 : i32, i32
  }
}

</mosaic_0001>

<bundles_post_ra>
// kernel: ann_forward.1
= control target key start
LH: loop header
LB: loop body
LE: loop exit
PB: predicated region body
PF: predicated region fallthrough
CT: control target
= control target key end

     0   :  { %14 = vsyncpa [#allocation3], 0  ;;  %s1456_s0 = inlined_call_operand.vmem [shape: f32[8,32], index: 0, kind: input, shape index: {}]   ;;  %s1457_s1 = inlined_call_operand.vmem [shape: bf16[32,256], index: 1, kind: input, shape index: {}]   ;;  %s1458_s2 = inlined_call_operand.vmem [shape: f32[1,256], index: 2, kind: input, shape index: {}]   ;;  %s1459_s3 = inlined_call_operand.hbm [shape: bf16[256,128], index: 3, kind: input, shape index: {}]   ;;  %s1460_s4 = inlined_call_operand.vmem [shape: f32[1,128], index: 4, kind: input, shape index: {}]   ;;  %s1461_s5 = inlined_call_operand.vmem [shape: bf16[128,64], index: 5, kind: input, shape index: {}]   ;;  %s1462_s6 = inlined_call_operand.vmem [shape: f32[1,64], index: 6, kind: input, shape index: {}]   ;;  %s1463_s7 = inlined_call_operand.vmem [shape: f32[2,64], index: 7, kind: input, shape index: {}]   ;;  %s1464_s8 = inlined_call_operand.vmem [shape: f32[2,1], index: 8, kind: input, shape index: {}]   ;;  %s1465_s9 = inlined_call_operand.hbm [shape: f32[2,8], index: 9, kind: output, shape index: {}]  }
   0x1   :  { %15 = vsyncpa [#allocation4], 0  ;;  %s1180_s30 = smov [#allocation2]  }
   0x2   :  { %s27_s10 = sshll.u32 %s1180_s30, 4  ;;  %s28_s10 = int_to_ptr.vmem [resolvable:$true] %s27_s10 }
   0x3   :  { %s1144_s11 = scalar_lea.vmem %s28_s10, 2048  ;;  %p1149_p1 = scmp.lt.s32.totalorder %s28_s10, %s28_s10 }
   0x4   :  { %p1145_p0 = scmp.ne.s32.totalorder %s28_s10, %s1144_s11  ;;  %p1150_p2 = scmp.lt.s32.totalorder %s1144_s11, %s1144_s11 }
   0x6   :  { %p1151_p3 = por %p1150_p2, %p1149_p1 }
   0x8   :  { %p1152_p4 = pnand %p1151_p3, %p1145_p0 }
   0xa   :  { %1155 = shalt.err (!%p1152_p4)
}
   0xb   :  { %s1181_s12 = smov 64   ;;  %s1182_s13 = smov 4  }
   0xc   :  { %33 = dma.hbm_to_vmem [thread:$0]  %s1459_s3, 2048, %s28_s10, [#allocation3], %s1181_s12, %s1181_s12, %s1182_s13  }
   0xd   :  { %1176 = dma.done.wait [#allocation3], 2048  }
   0xe   :  { %1177 = vsyncadd [#allocation3], 4294965248  ;;  %v1183_v0 = vmov 0   ;;  %v1106_v1 = vld [vmem:[%s1457_s1 + $0x14] ss:$8 sps:$4 sm:$0xff]   ;;  %v48_v5 = vld [vmem:[%s1456_s0] sm:$0xff]  ;;  %v78_v48 = vlaneseq }
   0xf   :  { %165 = vmatprep.mubr.bf16.mxu0 %v1183_v0  ;;  %1105 = vset.pattern.permute.xlu0 %v1183_v0  ;;  %v1108_v2 = vld [vmem:[%s1457_s1 + $0x10] ss:$8 sps:$4 sm:$0xff]   ;;  %v1109_v3 = vld [vmem:[%s1457_s1 + $0x4] ss:$8 sps:$4 sm:$0xff]   ;;  %v1111_v4 = vld [vmem:[%s1457_s1] ss:$8 sps:$4 sm:$0xff]  }
  0x10   :  { %145 = vmatprep.subr.bf16.mxu0 %v1106_v1  ;;  %v49_v6 = vld [vmem:[%s1456_s0 + $0x8] sm:$0xff]  ;;  %vm108_vm0 = vcmask 261120   ;;  %v1112_v8 = vld [vmem:[#allocation2 + $0x78] sm:$0xff]   ;;  %v50_v9 = vld [vmem:[%s1456_s0 + $0x10] sm:$0xff]  ;;  %v79_v49 = vshrl.u32 %v78_v48, 7  ;;  %vm1185_vm1 = vmmov 0  }
  0x11   :  { %146 = vmatpush1.bf16.msra.mxu0 %v1108_v2  ;;  %v64_v7 = vpack.c.bf16 %v49_v6, %v48_v5  ;;  %v51_v10 = vld [vmem:[%s1456_s0 + $0x18] sm:$0xff]  ;;  %934 = vmatprep.subr.bf16.mxu1 %v1112_v8  ;;  %v1114_v12 = vld [vmem:[#allocation2 + $0x70] sm:$0xff]   ;;  %v1116_v14 = vld [vmem:[#allocation2 + $0x68] sm:$0xff]   ;;  %vm741_vm2 = vcmask 523264   ;;  %s1186_s29 = smov [#allocation5]  }
  0x12   :  { %147 = vmatprep.subr.bf16.mxu0 %v1109_v3  ;;  %v1113_v11 = vld [vmem:[#allocation2 + $0x38] sm:$0xff]   ;;  %v1115_v13 = vld [vmem:[#allocation2 + $0x30] sm:$0xff]   ;;  %v65_v15 = vpack.c.bf16 %v51_v10, %v50_v9  ;;  %v1117_v16 = vld [vmem:[#allocation2 + $0x28] sm:$0xff]   ;;  %v84_v50 = vsub.s32 1, %v79_v49  ;;  %v80_v51 = vsub.s32 0, %v79_v49  ;;  %s870_s30 = sshll.u32 %s1186_s29, 4  ;;  %s871_s30 = int_to_ptr.vmem [resolvable:$true] %s870_s30 }
  0x13   :  { %935 = vmatpush3.bf16.msra.mxu1 %v1113_v11  ;;  %v1118_v17 = vld [vmem:[#allocation2 + $0x60] sm:$0xff]   ;;  %v53_v19 = vld [vmem:[%s1456_s0 + $0x28] sm:$0xff]  ;;  %v1120_v21 = vld [vmem:[#allocation2 + $0x58] sm:$0xff]   ;;  %s1156_s1 = scalar_lea.vmem %s871_s30, 32  ;;  %p1161_p6 = scmp.lt.s32.totalorder %s871_s30, %s871_s30 }
  0x14   :  { %936 = vmatprep.subr.bf16.mxu1 %v1114_v12  ;;  %v52_v18 = vld [vmem:[%s1456_s0 + $0x20] sm:$0xff]  ;;  %v1121_v22 = vld [vmem:[#allocation2 + $0x18] sm:$0xff]   ;;  %v54_v24 = vld [vmem:[%s1456_s0 + $0x30] sm:$0xff]  ;;  %p1157_p5 = scmp.ne.s32.totalorder %s871_s30, %s1156_s1  ;;  %p1162_p7 = scmp.lt.s32.totalorder %s1156_s1, %s1156_s1 }
  0x15   :  { %148 = vmatpush1.bf16.msra.mxu0 %v1111_v4  ;;  %v1119_v20 = vld [vmem:[#allocation2 + $0x20] sm:$0xff]   ;;  %v66_v23 = vpack.c.bf16 %v53_v19, %v52_v18  ;;  %v55_v25 = vld [vmem:[%s1456_s0 + $0x38] sm:$0xff]  ;;  %v57_v28 = vld [vmem:[%s1456_s0 + $0x48] sm:$0xff] }
  0x16   :  { %v67_v26 = vpack.c.bf16 %v55_v25, %v54_v24  ;;  %v56_v27 = vld [vmem:[%s1456_s0 + $0x40] sm:$0xff]  ;;  %v58_v30 = vld [vmem:[%s1456_s0 + $0x50] sm:$0xff]  ;;  %v59_v31 = vld [vmem:[%s1456_s0 + $0x58] sm:$0xff]  ;;  %p1163_p8 = por %p1162_p7, %p1161_p6 }
  0x17   :  { %937 = vmatpush3.bf16.msra.mxu1 %v1115_v13  ;;  %v68_v29 = vpack.c.bf16 %v57_v28, %v56_v27  ;;  %v69_v32 = vpack.c.bf16 %v59_v31, %v58_v30  ;;  %v60_v33 = vld [vmem:[%s1456_s0 + $0x60] sm:$0xff]  ;;  %v61_v34 = vld [vmem:[%s1456_s0 + $0x68] sm:$0xff]  ;;  %v62_v36 = vld [vmem:[%s1456_s0 + $0x70] sm:$0xff] }
  0x18   :  { %883 = vmatmul.mubr.msk.bf16.vlgmr.msra.gmra.mxu0 %vm108_vm0, %v64_v7  ;;  %938 = vmatprep.subr.bf16.mxu1 %v1116_v14  ;;  %v70_v35 = vpack.c.bf16 %v61_v34, %v60_v33  ;;  %v63_v37 = vld [vmem:[%s1456_s0 + $0x78] sm:$0xff]  ;;  %v1122_v39 = vld [vmem:[#allocation2 + $0x50] sm:$0xff]   ;;  %v1124_v41 = vld [vmem:[#allocation2 + $0x48] sm:$0xff]   ;;  %p1164_p9 = pnand %p1163_p8, %p1157_p5 }
  0x19   :  { %175 = vmatprep.mubr.bf16.mxu0 %v1183_v0  ;;  %v71_v38 = vpack.c.bf16 %v63_v37, %v62_v36  ;;  %v1123_v40 = vld [vmem:[#allocation2 + $0x10] sm:$0xff]   ;;  %v1125_v42 = vld [vmem:[#allocation2 + $0x8] sm:$0xff]   ;;  %v1126_v43 = vld [vmem:[#allocation2 + $0x40] sm:$0xff]  }
  0x1a   :  { %v1127_v44 = vld [vmem:[#allocation2] sm:$0xff]   ;;  %v1128_v45 = vld [vmem:[%s1461_s5 + $0x38] sm:$0xff]   ;;  %v1129_v46 = vld [vmem:[%s1461_s5 + $0x30] sm:$0xff]  }
  0x1b   :  { %939 = vmatpush3.bf16.msra.mxu1 %v1117_v16  ;;  %1031 = vmatprep.subr.bf16.mxu0 %v1128_v45  ;;  %v1130_v47 = vld [vmem:[%s1461_s5 + $0x28] sm:$0xff]   ;;  %v76_v52 = vld [vmem:[%s1458_s2] sm:$0x3] }
  0x1c   :  { %940 = vmatprep.subr.bf16.mxu1 %v1118_v17  ;;  %1032 = vmatpush3.bf16.msra.mxu0 %v1128_v45  ;;  %v1329_v54 = vrot.slane %v76_v52, %v84_v50  ;;  %v1331_v55 = vrot.slane %v76_v52, %v80_v51 }
  0x1d   :  { %1033 = vmatprep.subr.bf16.mxu0 %v1129_v46 }
  0x1f   :  { %941 = vmatpush3.bf16.msra.mxu1 %v1119_v20 }
  0x20   :  { %884 = vmatmul.mubr.msk.bf16.gmra.mxu0 %vm108_vm0, %v65_v15  ;;  %942 = vmatprep.subr.bf16.mxu1 %v1120_v21 }
  0x21   :  { %185 = vmatprep.mubr.bf16.mxu0 %v1183_v0  ;;  %1034 = vmatpush3.bf16.msra.mxu0 %v1129_v46 }
  0x22   :  { %1035 = vmatprep.subr.bf16.mxu0 %v1130_v47 }
  0x23   :  { %943 = vmatpush3.bf16.msra.mxu1 %v1121_v22 }
  0x24   :  { %944 = vmatprep.subr.bf16.mxu1 %v1122_v39 }
  0x25   :  { %1036 = vmatpush3.bf16.msra.mxu0 %v1130_v47 }
  0x27   :  { %945 = vmatpush3.bf16.msra.mxu1 %v1123_v40 }
  0x28   :  { %885 = vmatmul.mubr.msk.bf16.gmra.mxu0 %vm108_vm0, %v66_v23  ;;  %946 = vmatprep.subr.bf16.mxu1 %v1124_v41 }
  0x29   :  { %195 = vmatprep.mubr.bf16.mxu0 %v1183_v0 }
  0x2b   :  { %947 = vmatpush3.bf16.msra.mxu1 %v1125_v42 }
  0x2c   :  { %948 = vmatprep.subr.bf16.mxu1 %v1126_v43 }
  0x2f   :  { %949 = vmatpush3.bf16.msra.mxu1 %v1127_v44 }
  0x30   :  { %886 = vmatmul.mubr.msk.bf16.gmra.mxu0 %vm108_vm0, %v67_v26 }
  0x31   :  { %205 = vmatprep.mubr.bf16.mxu0 %v1183_v0 }
  0x38   :  { %887 = vmatmul.mubr.msk.bf16.gmra.mxu0 %vm108_vm0, %v68_v29 }
  0x39   :  { %215 = vmatprep.mubr.bf16.mxu0 %v1183_v0 }
  0x40   :  { %888 = vmatmul.mubr.msk.bf16.gmra.mxu0 %vm108_vm0, %v69_v32 }
  0x41   :  { %225 = vmatprep.mubr.bf16.mxu0 %v1183_v0 }
  0x48   :  { %889 = vmatmul.mubr.msk.bf16.gmra.mxu0 %vm108_vm0, %v70_v35 }
  0x49   :  { %235 = vmatprep.mubr.bf16.mxu0 %v1183_v0 }
  0x50   :  { %890 = vmatmul.mubr.msk.bf16.gmra.mxu0 %vm108_vm0, %v71_v38 }
  0xd8   :  { %v167_v53 = vpop.f32.mrf.mxu0 }
  0xd9   :  { %v168_v60 = vadd.f32 %v167_v53, %v1331_v55 }
  0xda   :  { %v169_v56 = vpop.f32.mrf.mxu0 }
  0xdb   :  { %v170_v58 = vadd.f32 %v169_v56, %v1329_v54  ;;  %v246_v3 = vmax.f32 %v168_v60, 0.0 }
  0xdc   :  { %v171_v57 = vpop.f32.mrf.mxu0 }
  0xdd   :  { %v172_v59 = vadd.f32 %v171_v57, %v1331_v55  ;;  %v247_v1 = vmax.f32 %v170_v58, 0.0 }
  0xde   :  { %v173_v61 = vpop.f32.mrf.mxu0 }
  0xdf   :  { %v174_v62 = vadd.f32 %v173_v61, %v1329_v54  ;;  %v248_v63 = vmax.f32 %v172_v59, 0.0 }
  0xe0   :  { %v177_v0 = vpop.f32.mrf.mxu0 }
  0xe1   :  { %v249_v2 = vmax.f32 %v174_v62, 0.0  ;;  %v278_v6 = vpack.c.bf16 %v248_v63, %v246_v3  ;;  %v178_v10 = vadd.f32 %v177_v0, %v1331_v55 }
  0xe2   :  { %v179_v4 = vpop.f32.mrf.mxu0 }
  0xe3   :  { %v279_v5 = vpack.c.bf16 %v249_v2, %v247_v1  ;;  %v180_v8 = vadd.f32 %v179_v4, %v1329_v54  ;;  %v250_v17 = vmax.f32 %v178_v10, 0.0 }
  0xe4   :  { %v181_v7 = vpop.f32.mrf.mxu0 }
  0xe5   :  { %v182_v9 = vadd.f32 %v181_v7, %v1331_v55  ;;  %461 = vmatprep.mubr.bf16.mxu1 %v279_v5  ;;  %v251_v15 = vmax.f32 %v180_v8, 0.0 }
  0xe6   :  { %v183_v11 = vpop.f32.mrf.mxu0  ;;  %462 = vmatmul.mubr.bf16.vlgmr.msra.gmra.mxu1 %v278_v6 }
  0xe7   :  { %v184_v12 = vadd.f32 %v183_v11, %v1329_v54  ;;  %v252_v13 = vmax.f32 %v182_v9, 0.0 }
  0xe8   :  { %v187_v14 = vpop.f32.mrf.mxu0 }
  0xe9   :  { %v253_v16 = vmax.f32 %v184_v12, 0.0  ;;  %v280_v20 = vpack.c.bf16 %v252_v13, %v250_v17  ;;  %v188_v24 = vadd.f32 %v187_v14, %v1331_v55 }
  0xea   :  { %v189_v18 = vpop.f32.mrf.mxu0 }
  0xeb   :  { %v281_v19 = vpack.c.bf16 %v253_v16, %v251_v15  ;;  %v190_v22 = vadd.f32 %v189_v18, %v1329_v54  ;;  %v254_v31 = vmax.f32 %v188_v24, 0.0 }
  0xec   :  { %v191_v21 = vpop.f32.mrf.mxu0 }
  0xed   :  { %v192_v23 = vadd.f32 %v191_v21, %v1331_v55  ;;  %469 = vmatprep.mubr.bf16.mxu1 %v281_v19  ;;  %v255_v29 = vmax.f32 %v190_v22, 0.0 }
  0xee   :  { %v193_v25 = vpop.f32.mrf.mxu0  ;;  %470 = vmatmul.mubr.bf16.gmra.mxu1 %v280_v20 }
  0xef   :  { %v194_v26 = vadd.f32 %v193_v25, %v1329_v54  ;;  %v256_v27 = vmax.f32 %v192_v23, 0.0 }
  0xf0   :  { %v197_v28 = vpop.f32.mrf.mxu0 }
  0xf1   :  { %v257_v30 = vmax.f32 %v194_v26, 0.0  ;;  %v282_v34 = vpack.c.bf16 %v256_v27, %v254_v31  ;;  %v198_v38 = vadd.f32 %v197_v28, %v1331_v55 }
  0xf2   :  { %v199_v32 = vpop.f32.mrf.mxu0 }
  0xf3   :  { %v283_v33 = vpack.c.bf16 %v257_v30, %v255_v29  ;;  %v200_v36 = vadd.f32 %v199_v32, %v1329_v54  ;;  %v258_v45 = vmax.f32 %v198_v38, 0.0 }
  0xf4   :  { %v201_v35 = vpop.f32.mrf.mxu0 }
  0xf5   :  { %v202_v37 = vadd.f32 %v201_v35, %v1331_v55  ;;  %477 = vmatprep.mubr.bf16.mxu1 %v283_v33  ;;  %v259_v43 = vmax.f32 %v200_v36, 0.0 }
  0xf6   :  { %v203_v39 = vpop.f32.mrf.mxu0  ;;  %478 = vmatmul.mubr.bf16.gmra.mxu1 %v282_v34 }
  0xf7   :  { %v204_v40 = vadd.f32 %v203_v39, %v1329_v54  ;;  %v260_v41 = vmax.f32 %v202_v37, 0.0 }
  0xf8   :  { %v207_v42 = vpop.f32.mrf.mxu0 }
  0xf9   :  { %v261_v44 = vmax.f32 %v204_v40, 0.0  ;;  %v284_v48 = vpack.c.bf16 %v260_v41, %v258_v45  ;;  %v208_v52 = vadd.f32 %v207_v42, %v1331_v55  ;;  %v1131_v41 = vld [vmem:[%s1461_s5 + $0x20] sm:$0xff]   ;;  %v1134_v42 = vld [vmem:[%s1461_s5 + $0x8] sm:$0xff]  }
  0xfa   :  { %v209_v46 = vpop.f32.mrf.mxu0  ;;  %1037 = vmatprep.subr.bf16.mxu0 %v1131_v41 }
  0xfb   :  { %v285_v47 = vpack.c.bf16 %v261_v44, %v259_v43  ;;  %v210_v50 = vadd.f32 %v209_v46, %v1329_v54  ;;  %v262_v61 = vmax.f32 %v208_v52, 0.0  ;;  %1038 = vmatpush3.bf16.msra.mxu0 %v1131_v41  ;;  %v1135_v43 = vld [vmem:[%s1461_s5] sm:$0xff]  }
  0xfc   :  { %v211_v49 = vpop.f32.mrf.mxu0 }
  0xfd   :  { %v212_v51 = vadd.f32 %v211_v49, %v1331_v55  ;;  %485 = vmatprep.mubr.bf16.mxu1 %v285_v47  ;;  %v263_v59 = vmax.f32 %v210_v50, 0.0  ;;  %v1383_v47 = vld [vmem:[%s1460_s4] ss:$0 sm:$0xff] }
  0xfe   :  { %v213_v53 = vpop.f32.mrf.mxu0  ;;  %486 = vmatmul.mubr.bf16.gmra.mxu1 %v284_v48 }
  0xff   :  { %v214_v56 = vadd.f32 %v213_v53, %v1329_v54  ;;  %v264_v57 = vmax.f32 %v212_v51, 0.0 }
 0x100   :  { %v217_v58 = vpop.f32.mrf.mxu0 }
 0x101   :  { %v265_v60 = vmax.f32 %v214_v56, 0.0  ;;  %v286_v0 = vpack.c.bf16 %v264_v57, %v262_v61  ;;  %v218_v4 = vadd.f32 %v217_v58, %v1331_v55 }
 0x102   :  { %v219_v62 = vpop.f32.mrf.mxu0 }
 0x103   :  { %v287_v63 = vpack.c.bf16 %v265_v60, %v263_v59  ;;  %v220_v2 = vadd.f32 %v219_v62, %v1329_v54  ;;  %v266_v11 = vmax.f32 %v218_v4, 0.0 }
 0x104   :  { %v221_v1 = vpop.f32.mrf.mxu0 }
 0x105   :  { %v222_v3 = vadd.f32 %v221_v1, %v1331_v55  ;;  %493 = vmatprep.mubr.bf16.mxu1 %v287_v63  ;;  %v267_v9 = vmax.f32 %v220_v2, 0.0 }
 0x106   :  { %v223_v5 = vpop.f32.mrf.mxu0  ;;  %494 = vmatmul.mubr.bf16.gmra.mxu1 %v286_v0 }
 0x107   :  { %v224_v6 = vadd.f32 %v223_v5, %v1329_v54  ;;  %v268_v7 = vmax.f32 %v222_v3, 0.0 }
 0x108   :  { %v227_v8 = vpop.f32.mrf.mxu0 }
 0x109   :  { %v269_v10 = vmax.f32 %v224_v6, 0.0  ;;  %v288_v14 = vpack.c.bf16 %v268_v7, %v266_v11  ;;  %v228_v18 = vadd.f32 %v227_v8, %v1331_v55 }
 0x10a   :  { %v229_v12 = vpop.f32.mrf.mxu0 }
 0x10b   :  { %v289_v13 = vpack.c.bf16 %v269_v10, %v267_v9  ;;  %v230_v16 = vadd.f32 %v229_v12, %v1329_v54  ;;  %v270_v25 = vmax.f32 %v228_v18, 0.0 }
 0x10c   :  { %v231_v15 = vpop.f32.mrf.mxu0 }
 0x10d   :  { %v232_v17 = vadd.f32 %v231_v15, %v1331_v55  ;;  %501 = vmatprep.mubr.bf16.mxu1 %v289_v13  ;;  %v271_v23 = vmax.f32 %v230_v16, 0.0 }
 0x10e   :  { %v233_v19 = vpop.f32.mrf.mxu0  ;;  %502 = vmatmul.mubr.bf16.gmra.mxu1 %v288_v14 }
 0x10f   :  { %v234_v20 = vadd.f32 %v233_v19, %v1329_v54  ;;  %v272_v21 = vmax.f32 %v232_v17, 0.0 }
 0x110   :  { %v237_v22 = vpop.f32.mrf.mxu0 }
 0x111   :  { %v273_v24 = vmax.f32 %v234_v20, 0.0  ;;  %v290_v28 = vpack.c.bf16 %v272_v21, %v270_v25  ;;  %v238_v32 = vadd.f32 %v237_v22, %v1331_v55 }
 0x112   :  { %v239_v26 = vpop.f32.mrf.mxu0 }
 0x113   :  { %v291_v27 = vpack.c.bf16 %v273_v24, %v271_v23  ;;  %v240_v30 = vadd.f32 %v239_v26, %v1329_v54  ;;  %v274_v38 = vmax.f32 %v238_v32, 0.0 }
 0x114   :  { %v241_v29 = vpop.f32.mrf.mxu0 }
 0x115   :  { %v242_v31 = vadd.f32 %v241_v29, %v1331_v55  ;;  %509 = vmatprep.mubr.bf16.mxu1 %v291_v27  ;;  %v275_v36 = vmax.f32 %v240_v30, 0.0  ;;  %v1132_v55 = vld [vmem:[%s1461_s5 + $0x18] sm:$0xff]  }
 0x116   :  { %v243_v33 = vpop.f32.mrf.mxu0  ;;  %510 = vmatmul.mubr.bf16.gmra.mxu1 %v290_v28  ;;  %1039 = vmatprep.subr.bf16.mxu0 %v1132_v55 }
 0x117   :  { %v244_v34 = vadd.f32 %v243_v33, %v1329_v54  ;;  %v276_v35 = vmax.f32 %v242_v31, 0.0  ;;  %1040 = vmatpush3.bf16.msra.mxu0 %v1132_v55  ;;  %v1133_v54 = vld [vmem:[%s1461_s5 + $0x10] sm:$0xff]  }
 0x118   :  { %1041 = vmatprep.subr.bf16.mxu0 %v1133_v54 }
 0x119   :  { %v277_v37 = vmax.f32 %v244_v34, 0.0  ;;  %v292_v40 = vpack.c.bf16 %v276_v35, %v274_v38 }
 0x11b   :  { %v293_v39 = vpack.c.bf16 %v277_v37, %v275_v36  ;;  %1042 = vmatpush3.bf16.msra.mxu0 %v1133_v54 }
 0x11c   :  { %1043 = vmatprep.subr.bf16.mxu0 %v1134_v42 }
 0x11d   :  { %517 = vmatprep.mubr.bf16.mxu1 %v293_v39 }
 0x11e   :  { %518 = vmatmul.mubr.bf16.gmra.mxu1 %v292_v40 }
 0x11f   :  { %1044 = vmatpush3.bf16.msra.mxu0 %v1134_v42 }
 0x120   :  { %1045 = vmatprep.subr.bf16.mxu0 %v1135_v43 }
 0x123   :  { %1046 = vmatpush3.bf16.msra.mxu0 %v1135_v43 }
 0x1a6   :  { %v950_v44 = vpop.f32.mrf.mxu1 }
 0x1a8   :  { %v951_v45 = vpop.f32.mrf.mxu1 }
 0x1a9   :  { %v952_v46 = vadd.f32 %v951_v45, %v950_v44 }
 0x1aa   :  { %v953_v48 = vpop.f32.mrf.mxu1 }
 0x1ab   :  { %v464_v50 = vadd.f32 %v952_v46, %v1383_v47 }
 0x1ac   :  { %v954_v49 = vpop.f32.mrf.mxu1 }
 0x1ad   :  { %v955_v51 = vadd.f32 %v954_v49, %v953_v48  ;;  %v526_v57 = vmax.f32 %v464_v50, 0.0 }
 0x1ae   :  { %v956_v52 = vpop.f32.mrf.mxu1 }
 0x1af   :  { %v467_v53 = vadd.f32 %v955_v51, %v1383_v47 }
 0x1b0   :  { %v957_v56 = vpop.f32.mrf.mxu1 }
 0x1b1   :  { %v527_v58 = vmax.f32 %v467_v53, 0.0  ;;  %v958_v59 = vadd.f32 %v957_v56, %v956_v52 }
 0x1b2   :  { %v959_v60 = vpop.f32.mrf.mxu1 }
 0x1b3   :  { %v542_v61 = vpack.c.bf16 %v527_v58, %v526_v57  ;;  %v472_v63 = vadd.f32 %v958_v59, %v1383_v47 }
 0x1b4   :  { %v960_v62 = vpop.f32.mrf.mxu1 }
 0x1b5   :  { %v961_v0 = vadd.f32 %v960_v62, %v959_v60  ;;  %1047 = vmatprep.mubr.bf16.mxu0 %v542_v61  ;;  %v528_v4 = vmax.f32 %v472_v63, 0.0 }
 0x1b6   :  { %v962_v1 = vpop.f32.mrf.mxu1 }
 0x1b7   :  { %v475_v2 = vadd.f32 %v961_v0, %v1383_v47 }
 0x1b8   :  { %v963_v3 = vpop.f32.mrf.mxu1 }
 0x1b9   :  { %v529_v5 = vmax.f32 %v475_v2, 0.0  ;;  %v964_v6 = vadd.f32 %v963_v3, %v962_v1 }
 0x1ba   :  { %v965_v7 = vpop.f32.mrf.mxu1 }
 0x1bb   :  { %v543_v8 = vpack.c.bf16 %v529_v5, %v528_v4  ;;  %v480_v10 = vadd.f32 %v964_v6, %v1383_v47 }
 0x1bc   :  { %v966_v9 = vpop.f32.mrf.mxu1 }
 0x1bd   :  { %v967_v11 = vadd.f32 %v966_v9, %v965_v7  ;;  %1048 = vmatmul.mubr.bf16.vlgmr.msra.gmra.mxu0 %v543_v8  ;;  %v530_v15 = vmax.f32 %v480_v10, 0.0  ;;  %v1184_v8 = vmov 0.0   ;;  %v735_v9 = vld [vmem:[%s1464_s8] sm:$0x3] }
 0x1be   :  { %v968_v12 = vpop.f32.mrf.mxu1  ;;  %1063 = vmatprep.subr.mxu1 %v1184_v8  ;;  %1095 = vmatprep.mubr.msk.f32.mxu1 %vm1185_vm1, %v1184_v8 }
 0x1bf   :  { %v483_v13 = vadd.f32 %v967_v11, %v1383_v47  ;;  %738 = vperm.xlu0 %1105, %v735_v9  }
 0x1c0   :  { %v969_v14 = vpop.f32.mrf.mxu1 }
 0x1c1   :  { %v531_v16 = vmax.f32 %v483_v13, 0.0  ;;  %v970_v17 = vadd.f32 %v969_v14, %v968_v12 }
 0x1c2   :  { %v971_v18 = vpop.f32.mrf.mxu1 }
 0x1c3   :  { %v544_v19 = vpack.c.bf16 %v531_v16, %v530_v15  ;;  %v488_v21 = vadd.f32 %v970_v17, %v1383_v47 }
 0x1c4   :  { %v972_v20 = vpop.f32.mrf.mxu1 }
 0x1c5   :  { %v973_v22 = vadd.f32 %v972_v20, %v971_v18  ;;  %1051 = vmatprep.mubr.bf16.mxu0 %v544_v19  ;;  %v532_v26 = vmax.f32 %v488_v21, 0.0 }
 0x1c6   :  { %v974_v23 = vpop.f32.mrf.mxu1 }
 0x1c7   :  { %v491_v24 = vadd.f32 %v973_v22, %v1383_v47 }
 0x1c8   :  { %v975_v25 = vpop.f32.mrf.mxu1 }
 0x1c9   :  { %v533_v27 = vmax.f32 %v491_v24, 0.0  ;;  %v976_v28 = vadd.f32 %v975_v25, %v974_v23  ;;  %v908_v23 = vld [vmem:[%s1462_s6] ss:$0 sm:$0xff] }
 0x1ca   :  { %v977_v29 = vpop.f32.mrf.mxu1 }
 0x1cb   :  { %v545_v30 = vpack.c.bf16 %v533_v27, %v532_v26  ;;  %v496_v32 = vadd.f32 %v976_v28, %v1383_v47 }
 0x1cc   :  { %v978_v31 = vpop.f32.mrf.mxu1 }
 0x1cd   :  { %v979_v33 = vadd.f32 %v978_v31, %v977_v29  ;;  %1052 = vmatmul.mubr.bf16.gmra.mxu0 %v545_v30  ;;  %v534_v37 = vmax.f32 %v496_v32, 0.0 }
 0x1ce   :  { %v980_v34 = vpop.f32.mrf.mxu1 }
 0x1cf   :  { %v499_v35 = vadd.f32 %v979_v33, %v1383_v47 }
 0x1d0   :  { %v981_v36 = vpop.f32.mrf.mxu1 }
 0x1d1   :  { %v535_v38 = vmax.f32 %v499_v35, 0.0  ;;  %v982_v39 = vadd.f32 %v981_v36, %v980_v34 }
 0x1d2   :  { %v983_v40 = vpop.f32.mrf.mxu1 }
 0x1d3   :  { %v546_v41 = vpack.c.bf16 %v535_v38, %v534_v37  ;;  %v504_v54 = vadd.f32 %v982_v39, %v1383_v47 }
 0x1d4   :  { %v984_v55 = vpop.f32.mrf.mxu1 }
 0x1d5   :  { %v985_v42 = vadd.f32 %v984_v55, %v983_v40  ;;  %1055 = vmatprep.mubr.bf16.mxu0 %v546_v41  ;;  %v536_v46 = vmax.f32 %v504_v54, 0.0 }
 0x1d6   :  { %v986_v43 = vpop.f32.mrf.mxu1 }
 0x1d7   :  { %v507_v44 = vadd.f32 %v985_v42, %v1383_v47 }
 0x1d8   :  { %v987_v45 = vpop.f32.mrf.mxu1 }
 0x1d9   :  { %v537_v48 = vmax.f32 %v507_v44, 0.0  ;;  %v988_v49 = vadd.f32 %v987_v45, %v986_v43 }
 0x1da   :  { %v989_v50 = vpop.f32.mrf.mxu1 }
 0x1db   :  { %v547_v51 = vpack.c.bf16 %v537_v48, %v536_v46  ;;  %v512_v53 = vadd.f32 %v988_v49, %v1383_v47 }
 0x1dc   :  { %v990_v52 = vpop.f32.mrf.mxu1 }
 0x1dd   :  { %v991_v56 = vadd.f32 %v990_v52, %v989_v50  ;;  %1056 = vmatmul.mubr.bf16.gmra.mxu0 %v547_v51  ;;  %v538_v60 = vmax.f32 %v512_v53, 0.0 }
 0x1de   :  { %v992_v57 = vpop.f32.mrf.mxu1 }
 0x1df   :  { %v515_v58 = vadd.f32 %v991_v56, %v1383_v47 }
 0x1e0   :  { %v993_v59 = vpop.f32.mrf.mxu1 }
 0x1e1   :  { %v539_v61 = vmax.f32 %v515_v58, 0.0  ;;  %v994_v62 = vadd.f32 %v993_v59, %v992_v57  ;;  %v734_v59 = vld [vmem:[%s1463_s7] sm:$0x3] }
 0x1e2   :  { %v995_v63 = vpop.f32.mrf.mxu1 }
 0x1e3   :  { %v548_v0 = vpack.c.bf16 %v539_v61, %v538_v60  ;;  %v520_v2 = vadd.f32 %v994_v62, %v1383_v47 }
 0x1e4   :  { %v996_v1 = vpop.f32.mrf.mxu1 }
 0x1e5   :  { %v997_v3 = vadd.f32 %v996_v1, %v995_v63  ;;  %1059 = vmatprep.mubr.bf16.mxu0 %v548_v0  ;;  %v540_v5 = vmax.f32 %v520_v2, 0.0 }
 0x1e7   :  { %v523_v4 = vadd.f32 %v997_v3, %v1383_v47 }
 0x1e9   :  { %v541_v6 = vmax.f32 %v523_v4, 0.0 }
 0x1eb   :  { %v549_v7 = vpack.c.bf16 %v541_v6, %v540_v5 }
 0x1ed   :  { %1060 = vmatmul.mubr.bf16.gmra.mxu0 %v549_v7 }
 0x23a   :  { %v739_v60 = vpop.permute.xlu0 %738 }
 0x27d   :  { %v1406_v10 = vpop.f32.mrf.mxu0 }
 0x27e   :  { %v664_v50 = vadd.f32 %v1406_v10, %v908_v23 }
 0x27f   :  { %v1408_v11 = vpop.f32.mrf.mxu0 }
 0x280   :  { %v720_v52 = vmax.f32 %v664_v50, 0.0  ;;  %v656_v56 = vadd.f32 %v908_v23, %v1408_v11 }
 0x281   :  { %v1050_v47 = vpop.f32.mrf.mxu0 }
 0x282   :  { %v667_v48 = vadd.f32 %v1050_v47, %v908_v23  ;;  %v718_v58 = vmax.f32 %v656_v56, 0.0 }
 0x283   :  { %v1410_v12 = vpop.f32.mrf.mxu0 }
 0x284   :  { %v721_v51 = vmax.f32 %v667_v48, 0.0  ;;  %v659_v53 = vadd.f32 %v908_v23, %v1410_v12 }
 0x286   :  { %v719_v57 = vmax.f32 %v659_v53, 0.0 }
 0x28d   :  { %v1053_v13 = vpop.f32.mrf.mxu0 }
 0x28e   :  { %v680_v54 = vadd.f32 %v1053_v13, %v908_v23 }
 0x28f   :  { %v671_v14 = vpop.f32.mrf.mxu0 }
 0x290   :  { %v724_v43 = vmax.f32 %v680_v54, 0.0  ;;  %v672_v45 = vadd.f32 %v908_v23, %v671_v14 }
 0x291   :  { %v1054_v15 = vpop.f32.mrf.mxu0 }
 0x292   :  { %v683_v41 = vadd.f32 %v1054_v15, %v908_v23  ;;  %v722_v49 = vmax.f32 %v672_v45, 0.0 }
 0x293   :  { %v674_v16 = vpop.f32.mrf.mxu0 }
 0x294   :  { %v725_v42 = vmax.f32 %v683_v41, 0.0  ;;  %v675_v44 = vadd.f32 %v908_v23, %v674_v16 }
 0x296   :  { %v723_v46 = vmax.f32 %v675_v44, 0.0 }
 0x29d   :  { %v1057_v17 = vpop.f32.mrf.mxu0 }
 0x29e   :  { %v696_v35 = vadd.f32 %v1057_v17, %v908_v23 }
 0x29f   :  { %v687_v18 = vpop.f32.mrf.mxu0 }
 0x2a0   :  { %v728_v37 = vmax.f32 %v696_v35, 0.0  ;;  %v688_v39 = vadd.f32 %v908_v23, %v687_v18 }
 0x2a1   :  { %v1058_v19 = vpop.f32.mrf.mxu0 }
 0x2a2   :  { %v699_v33 = vadd.f32 %v1058_v19, %v908_v23  ;;  %v726_v55 = vmax.f32 %v688_v39, 0.0 }
 0x2a3   :  { %v690_v20 = vpop.f32.mrf.mxu0 }
 0x2a4   :  { %v729_v36 = vmax.f32 %v699_v33, 0.0  ;;  %v691_v38 = vadd.f32 %v908_v23, %v690_v20 }
 0x2a6   :  { %v727_v40 = vmax.f32 %v691_v38, 0.0 }
 0x2ad   :  { %v1061_v21 = vpop.f32.mrf.mxu0 }
 0x2ae   :  { %v712_v26 = vadd.f32 %v1061_v21, %v908_v23 }
 0x2af   :  { %v703_v22 = vpop.f32.mrf.mxu0 }
 0x2b0   :  { %v732_v29 = vmax.f32 %v712_v26, 0.0  ;;  %v704_v31 = vadd.f32 %v908_v23, %v703_v22 }
 0x2b1   :  { %v1062_v24 = vpop.f32.mrf.mxu0 }
 0x2b2   :  { %v715_v25 = vadd.f32 %v1062_v24, %v908_v23  ;;  %v730_v34 = vmax.f32 %v704_v31, 0.0 }
 0x2b3   :  { %v706_v28 = vpop.f32.mrf.mxu0 }
 0x2b4   :  { %v733_v27 = vmax.f32 %v715_v25, 0.0  ;;  %v707_v30 = vadd.f32 %v908_v23, %v706_v28 }
 0x2b6   :  { %1064 = vmatpush3.xpose.msk.msra.mxu1 %vm741_vm2, %v733_v27  ;;  %v731_v32 = vmax.f32 %v707_v30, 0.0 }
 0x2b7   :  { %1065 = vmatprep.subr.mxu1 %v1184_v8 }
 0x2ba   :  { %1066 = vmatpush3.xpose.msk.msra.mxu1 %vm741_vm2, %v732_v29 }
 0x2bb   :  { %1067 = vmatprep.subr.mxu1 %v1184_v8 }
 0x2be   :  { %1068 = vmatpush3.xpose.msk.msra.mxu1 %vm741_vm2, %v731_v32 }
 0x2bf   :  { %1069 = vmatprep.subr.mxu1 %v1184_v8 }
 0x2c2   :  { %1070 = vmatpush3.xpose.msk.msra.mxu1 %vm741_vm2, %v730_v34 }
 0x2c3   :  { %1071 = vmatprep.subr.mxu1 %v1184_v8 }
 0x2c6   :  { %1072 = vmatpush3.xpose.msk.msra.mxu1 %vm741_vm2, %v729_v36 }
 0x2c7   :  { %1073 = vmatprep.subr.mxu1 %v1184_v8 }
 0x2ca   :  { %1074 = vmatpush3.xpose.msk.msra.mxu1 %vm741_vm2, %v728_v37 }
 0x2cb   :  { %1075 = vmatprep.subr.mxu1 %v1184_v8 }
 0x2ce   :  { %1076 = vmatpush3.xpose.msk.msra.mxu1 %vm741_vm2, %v727_v40 }
 0x2cf   :  { %1077 = vmatprep.subr.mxu1 %v1184_v8 }
 0x2d2   :  { %1078 = vmatpush3.xpose.msk.msra.mxu1 %vm741_vm2, %v726_v55 }
 0x2d3   :  { %1079 = vmatprep.subr.mxu1 %v1184_v8 }
 0x2d6   :  { %1080 = vmatpush3.xpose.msk.msra.mxu1 %vm741_vm2, %v725_v42 }
 0x2d7   :  { %1081 = vmatprep.subr.mxu1 %v1184_v8 }
 0x2da   :  { %1082 = vmatpush3.xpose.msk.msra.mxu1 %vm741_vm2, %v724_v43 }
 0x2db   :  { %1083 = vmatprep.subr.mxu1 %v1184_v8 }
 0x2de   :  { %1084 = vmatpush3.xpose.msk.msra.mxu1 %vm741_vm2, %v723_v46 }
 0x2df   :  { %1085 = vmatprep.subr.mxu1 %v1184_v8 }
 0x2e2   :  { %1086 = vmatpush3.xpose.msk.msra.mxu1 %vm741_vm2, %v722_v49 }
 0x2e3   :  { %1087 = vmatprep.subr.mxu1 %v1184_v8 }
 0x2e6   :  { %1088 = vmatpush3.xpose.msk.msra.mxu1 %vm741_vm2, %v721_v51 }
 0x2e7   :  { %1089 = vmatprep.subr.mxu1 %v1184_v8 }
 0x2ea   :  { %1090 = vmatpush3.xpose.msk.msra.mxu1 %vm741_vm2, %v720_v52 }
 0x2eb   :  { %1091 = vmatprep.subr.mxu1 %v1184_v8 }
 0x2ee   :  { %1092 = vmatpush3.xpose.msk.msra.mxu1 %vm741_vm2, %v719_v57 }
 0x2ef   :  { %1093 = vmatprep.subr.mxu1 %v1184_v8 }
 0x2f2   :  { %1094 = vmatpush3.xpose.msk.msra.mxu1 %vm741_vm2, %v718_v58 }
 0x2f5   :  { %1096 = vmatmul.mubr.msk.f32.vlgmr.msra.gmra.mxu1 %vm741_vm2, %v734_v59 }
 0x3b5   :  { %v859_v61 = vpop.f32.mrf.mxu1 }
 0x3b6   :  { %v860_v62 = vadd.f32 %v859_v61, %v739_v60 }
 0x3b7   :  { %v1097_v63 = vpop.f32.mrf.mxu1 }
 0x3b8   :  { %863 = vst [vmem:[#allocation5] sm:$0x3] %v860_v62 }
 0x3b9   :  { %1167 = shalt.err (!%p1164_p9)
}
 0x3ba   :  { %873 = dma.vmem_to_hbm [thread:$0]  %s871_s30, 32, %s1465_s9, [#allocation4]  }
 0x3bb   :  { %1178 = dma.done.wait [#allocation4], 32  }
 0x3bc   :  { %1179 = vsyncadd [#allocation4], 4294967264 }
 0x3bd   :  { %877 = vsyncpa [#allocation3], 1 }
 0x3be   :  { %878 = vsyncpa [#allocation4], 1 }

</bundles_post_ra>
